<compile_context>
chip_gen: v7x
topology: tpu7x:2x2x1
jax: 0.10.0
libtpu: 0.0.40
codegen_flags: <defaults>
</compile_context>

<pallas_src>
import functools
import math

import jax
import jax.numpy as jnp
from jax.experimental import pallas as pl
from jax.experimental.pallas import tpu as pltpu


# ----------------------------- math helpers ---------------------------------

_GELU_C = math.sqrt(2.0 / math.pi)


def _gelu_tanh(x):
    # Matches torch.nn.GELU(approximate='tanh'); dtype follows the input.
    return 0.5 * x * (1.0 + jnp.tanh(_GELU_C * (x + 0.044715 * x * x * x)))


def _round_up(n, m):
    return ((n + m - 1) // m) * m


# ------------------------------- kernels -------------------------------------

def _mlp_kernel_resident(x_ref, w1_ref, b1_ref, w2_ref, b2_ref, o_ref, *, gelu_dtype):
    """Single-pass MLP row tile: full W1/W2 VMEM-resident, no hidden-dim loop."""
    h = jnp.dot(x_ref[...], w1_ref[...], preferred_element_type=jnp.float32)
    h = h + b1_ref[...].astype(jnp.float32)           # broadcast (1, H) over rows
    h = _gelu_tanh(h.astype(gelu_dtype))               # VPU/EUP
    y = jnp.dot(h.astype(w2_ref.dtype), w2_ref[...],
                preferred_element_type=jnp.float32)
    o_ref[...] = (y + b2_ref[...].astype(jnp.float32)).astype(o_ref.dtype)


def _mlp_kernel_stream(x_ref, w1_ref, b1_ref, w2_ref, b2_ref, o_ref, acc_ref, *, gelu_dtype):
    """Hidden-dim (k) tiled MLP with an f32 VMEM accumulator resident across k."""
    k = pl.program_id(1)

    @pl.when(k == 0)
    def _():
        acc_ref[...] = jnp.zeros_like(acc_ref)

    h = jnp.dot(x_ref[...], w1_ref[...], preferred_element_type=jnp.float32)
    h = h + b1_ref[...].astype(jnp.float32)
    h = _gelu_tanh(h.astype(gelu_dtype))
    acc_ref[...] += jnp.dot(h.astype(w2_ref.dtype), w2_ref[...],
                            preferred_element_type=jnp.float32)

    @pl.when(k == pl.num_programs(1) - 1)
    def _():
        # b2 added exactly once, in the finalize step.
        o_ref[...] = (acc_ref[...] + b2_ref[...].astype(jnp.float32)).astype(o_ref.dtype)


# ----------------------------- planning --------------------------------------

def _tpu_generation():
    try:
        kind = jax.devices()[0].device_kind.lower()
        for g in range(9, 1, -1):
            if f"v{g}" in kind:
                return g
    except Exception:
        pass
    return 0


def _vmem_caps():
    """(planning budget, hard clamp for vmem_limit_bytes), generation-aware."""
    try:
        cap = getattr(pltpu.get_tpu_info(), "vmem_capacity_bytes", None)
    except Exception:
        cap = None
    if not cap:
        cap = 64 << 20                      # conservative fallback = v7x per-core VMEM
    cap = int(cap)
    budget = cap - max(16 << 20, cap // 8)  # tile-planning target (room for internals)
    limit_max = cap - (4 << 20)             # never request more than physical - headroom
    return budget, limit_max


def _resident_vmem_bytes(tm, C, H, isz):
    x_b = 2 * tm * C * isz
    o_b = 2 * tm * C * isz
    w_b = 2 * (C * H + H * C + H + C) * isz   # conservative: 2 buffers per operand
    h_b = tm * H * (4 + isz)                  # f32 GELU intermediate + cast copy
    return x_b + o_b + w_b + h_b + (2 << 20)  # + slack for Mosaic internal scratch


def _stream_vmem_bytes(tm, th, C, H, isz, wbufs=2):
    x_b = 2 * tm * C * isz
    o_b = 2 * tm * C * isz
    w_b = wbufs * (C * th + th * C) * isz
    b_b = 2 * (th + C) * isz
    acc_b = tm * C * 4
    h_b = tm * th * (4 + isz)
    return x_b + o_b + w_b + b_b + acc_b + h_b + (2 << 20)


_TM_CANDIDATES = (1024, 768, 512, 384, 256, 192, 128, 96, 64, 48, 32, 16, 8)


def _pick_tm(M, fits):
    """Row tile: must fit VMEM; prefer >=2 tiles (v7x 2-TC), no padding, large tm."""
    M8 = max(8, _round_up(M, 8))
    cands = {c for c in _TM_CANDIDATES if c <= M8}
    if M8 <= 1024:
        cands.add(M8)
    cands = sorted((c for c in cands if fits(c)), reverse=True)
    if not cands:
        return None
    floor = min(256, M8)

    def n_tiles(tm):
        return -(-M8 // tm)

    def no_pad(tm):
        return M % tm == 0

    groups = (
        [c for c in cands if no_pad(c) and n_tiles(c) >= 2 and c >= floor],
        [c for c in cands if n_tiles(c) >= 2 and c >= floor],
        [c for c in cands if no_pad(c) and c >= floor],
        [c for c in cands if c >= floor],
        cands,
    )
    for g in groups:
        if g:
            return max(g)
    return cands[0]


def _plan_streaming(M, C, H, isz, budget, max_th=None):
    """Pick (th, tm) for the hidden-tiled path: big tm first, then big th."""
    th_cands = [t for t in (2048, 1024, 512, 256, 128) if H % t == 0]
    if max_th is not None:
        th_cands = [t for t in th_cands if t <= max_th]
    if not th_cands:
        th_cands = [H]
    M8 = max(8, _round_up(M, 8))
    best = None
    for th in th_cands:                 # descending: fewer accumulator RMW steps
        tm = _pick_tm(M, lambda t, th=th: _stream_vmem_bytes(t, th, C, H, isz) <= budget)
        if tm is None:
            continue
        if best is None or tm > best[1]:
            best = (th, tm)
        if tm >= min(768, M8):          # row tile big enough for weight-stream intensity
            break
    if best is None:
        best = (th_cands[-1], 8)        # last resort; vmem_limit clamped below
    return best


def _block_spec(shape, index_map, bufs=None):
    if bufs is not None and bufs != 2:
        try:
            return pl.BlockSpec(shape, index_map, pipeline_mode=pl.Buffered(bufs))
        except (TypeError, AttributeError):
            pass
    return pl.BlockSpec(shape, index_map)


# ------------------------------- wrapper --------------------------------------

@functools.partial(jax.jit, static_argnames=("compute_dtype", "force_streaming", "max_th"))
def mlp_forward(x, w1, b1, w2, b2, *, compute_dtype=None, force_streaming=False, max_th=None):
    """GPT MLP forward.  x: (B, T, C); w1: (C, H); b1: (1, H); w2: (H, C); b2: (1, C).

    Returns (B, T, C) in x's original dtype.  compute_dtype (e.g. jnp.bfloat16)
    casts MXU operands; accumulation stays f32.
    """
    B, T, C = x.shape
    H = w1.shape[1]
    M = B * T
    out_dtype = x.dtype

    cdt = jnp.dtype(compute_dtype) if compute_dtype is not None else jnp.dtype(x.dtype)
    x, w1, b1, w2, b2 = (a.astype(cdt) if a.dtype != cdt else a
                         for a in (x, w1, b1, w2, b2))
    isz = cdt.itemsize

    budget, limit_max = _vmem_caps()
    # bf16 GELU only where VPU/EUP natively support bf16 (v6e and later).
    gelu_dtype = cdt if (cdt == jnp.dtype(jnp.bfloat16) and _tpu_generation() >= 6) \
        else jnp.float32

    # ---------------------------- pick execution plan -------------------------
    resident_tm = None
    if not force_streaming:
        resident_tm = _pick_tm(M, lambda t: _resident_vmem_bytes(t, C, H, isz) <= budget)
    M8 = max(8, _round_up(M, 8))
    use_resident = resident_tm is not None and resident_tm >= min(256, M8)

    if use_resident:
        tm = resident_tm
        est = _resident_vmem_bytes(tm, C, H, isz)
        kernel = functools.partial(_mlp_kernel_resident, gelu_dtype=gelu_dtype)
        n_i = pl.cdiv(M, tm)
        grid = (n_i,)
        in_specs = [
            pl.BlockSpec((tm, C), lambda i: (i, 0)),   # x row tile (streamed)
            pl.BlockSpec((C, H), lambda i: (0, 0)),    # W1: constant index -> fetched once
            pl.BlockSpec((1, H), lambda i: (0, 0)),    # b1
            pl.BlockSpec((H, C), lambda i: (0, 0)),    # W2: constant index -> fetched once
            pl.BlockSpec((1, C), lambda i: (0, 0)),    # b2
        ]
        out_specs = pl.BlockSpec((tm, C), lambda i: (i, 0))
        scratch_shapes = []
        semantics = ("parallel",)
    else:
        th, tm = _plan_streaming(M, C, H, isz, budget, max_th=max_th)
        wbufs = 3 if _stream_vmem_bytes(tm, th, C, H, isz, wbufs=3) <= budget else 2
        est = _stream_vmem_bytes(tm, th, C, H, isz, wbufs=wbufs)
        kernel = functools.partial(_mlp_kernel_stream, gelu_dtype=gelu_dtype)
        n_i = pl.cdiv(M, tm)
        grid = (n_i, H // th)
        in_specs = [
            pl.BlockSpec((tm, C), lambda i, k: (i, 0)),         # x row tile
            _block_spec((C, th), lambda i, k: (0, k), wbufs),   # W1 hidden slice (streamed)
            pl.BlockSpec((1, th), lambda i, k: (0, k)),         # b1 hidden slice
            _block_spec((th, C), lambda i, k: (k, 0), wbufs),   # W2 hidden slice (streamed)
            pl.BlockSpec((1, C), lambda i, k: (0, 0)),          # b2 (used in finalize only)
        ]
        out_specs = pl.BlockSpec((tm, C), lambda i, k: (i, 0))
        scratch_shapes = [pltpu.VMEM((tm, C), jnp.float32)]
        semantics = ("parallel", "arbitrary")

    M_pad = n_i * tm
    x2 = x.reshape(M, C)
    if M_pad != M:
        # TODO(synk): a ragged last tile (pl.ds bounded by M) would avoid this copy.
        x2 = jnp.pad(x2, ((0, M_pad - M), (0, 0)))

    # Always set the scoped-VMEM limit (v5e default is only 16 MiB), clamped to
    # the chip's physical capacity minus headroom (v7x: 64 MiB).
    vmem_limit = int(min(limit_max, max(32 << 20, est + est // 4)))

    out2 = pl.pallas_call(
        kernel,
        out_shape=jax.ShapeDtypeStruct((M_pad, C), out_dtype),
        grid_spec=pltpu.PrefetchScalarGridSpec(
            num_scalar_prefetch=0,
            grid=grid,
            in_specs=in_specs,
            out_specs=out_specs,
            scratch_shapes=scratch_shapes,
        ),
        compiler_params=pltpu.CompilerParams(
            dimension_semantics=semantics,
            vmem_limit_bytes=vmem_limit,
        ),
    )(x2, w1, b1, w2, b2)

    if M_pad != M:
        out2 = out2[:M]
    return out2.reshape(B, T, C)


# --------------------------- params & reference -------------------------------

def init_params(key, n_embd, dtype=jnp.float32):
    """Deterministic init matching nn.Linear shapes (weights stored (in, out))."""
    hidden = 4 * n_embd
    k1, k2, k3, k4 = jax.random.split(key, 4)
    lim_fc = 1.0 / math.sqrt(n_embd)
    lim_pr = 1.0 / math.sqrt(hidden)
    w1 = jax.random.uniform(k1, (n_embd, hidden), jnp.float32, -lim_fc, lim_fc).astype(dtype)
    b1 = jax.random.uniform(k2, (1, hidden), jnp.float32, -lim_fc, lim_fc).astype(dtype)
    w2 = jax.random.uniform(k3, (hidden, n_embd), jnp.float32, -lim_pr, lim_pr).astype(dtype)
    b2 = jax.random.uniform(k4, (1, n_embd), jnp.float32, -lim_pr, lim_pr).astype(dtype)
    return w1, b1, w2, b2


def mlp_reference(x, w1, b1, w2, b2):
    h = jnp.einsum("btc,ch->bth", x.astype(jnp.float32), w1.astype(jnp.float32)) \
        + b1[0].astype(jnp.float32)
    h = _gelu_tanh(h)
    y = jnp.einsum("bth,hc->btc", h, w2.astype(jnp.float32)) + b2[0].astype(jnp.float32)
    return y.astype(x.dtype)


# --------------------------------- tests --------------------------------------

if __name__ == "__main__":
    key = jax.random.PRNGKey(0)
    kx, kp, kx2, kp2 = jax.random.split(key, 4)

    # --- Test 1: small GPT-style shapes (resident-weights path), f32 ----------
    batch, seq, n_embd = 2, 8, 32            # hidden = 4*n_embd = 128
    # NOTE: toy n_embd=32 (<128 lanes) means masked partial stores; production
    # n_embd is a multiple of 128 and the output is lane-dense.
    x = jax.random.normal(kx, (batch, seq, n_embd), jnp.float32)
    w1, b1, w2, b2 = init_params(kp, n_embd, dtype=jnp.float32)

    y = mlp_forward(x, w1, b1, w2, b2)
    jax.block_until_ready(y)
    y_ref = mlp_reference(x, w1, b1, w2, b2)
    assert y.shape == x.shape
    assert jnp.allclose(y, y_ref, atol=1e-5, rtol=1e-5), "resident path mismatch"

    # --- Test 2: exercise the streaming (hidden-tiled) path --------------------
    x2 = jax.random.normal(kx2, (2, 64, 128), jnp.float32)          # C=128, H=512
    p2 = init_params(kp2, 128, dtype=jnp.float32)
    y2 = mlp_forward(x2, *p2, force_streaming=True, max_th=128)     # 4 hidden tiles
    jax.block_until_ready(y2)
    y2_ref = mlp_reference(x2, *p2)
    assert jnp.allclose(y2, y2_ref, atol=1e-4, rtol=1e-4), "streaming path mismatch"

    # --- Test 3: bf16 compute path (looser tolerance: bf16 MXU / bf16 GELU) ----
    yb = mlp_forward(x, w1, b1, w2, b2, compute_dtype=jnp.bfloat16)
    jax.block_until_ready(yb)
    assert jnp.allclose(yb, y_ref, atol=0.15, rtol=0.15), "bf16 path mismatch"

    print("KERNEL_OK")
</pallas_src>

<mosaic_0001>
module attributes {stable_mosaic.version = 11 : i64} {
  func.func @_mlp_kernel_resident(%arg0: i32, %arg1: memref<16x32xf32, #tpu.memory_space<vmem>>, %arg2: memref<32x128xf32, #tpu.memory_space<vmem>>, %arg3: memref<1x128xf32, #tpu.memory_space<vmem>>, %arg4: memref<128x32xf32, #tpu.memory_space<vmem>>, %arg5: memref<1x32xf32, #tpu.memory_space<vmem>>, %arg6: memref<16x32xf32, #tpu.memory_space<vmem>>) attributes {dimension_semantics = [#tpu.dimension_semantics<parallel>], iteration_bounds = array<i64: 1>, scalar_prefetch = 0 : i64, scratch_operands = 0 : i64, tpu.core_type = #tpu.core_type<tc>, window_params = [{transform_indices = @transform_0, window_bounds = array<i64: 16, 32>}, {pipeline_mode = #tpu.pipeline_mode<synchronous>, transform_indices = @transform_1, window_bounds = array<i64: 32, 128>}, {pipeline_mode = #tpu.pipeline_mode<synchronous>, transform_indices = @transform_2, window_bounds = array<i64: 1, 128>}, {pipeline_mode = #tpu.pipeline_mode<synchronous>, transform_indices = @transform_3, window_bounds = array<i64: 128, 32>}, {pipeline_mode = #tpu.pipeline_mode<synchronous>, transform_indices = @transform_4, window_bounds = array<i64: 1, 32>}, {transform_indices = @transform_5, window_bounds = array<i64: 16, 32>}]} {
    %c0 = arith.constant 0 : index
    %c0_0 = arith.constant 0 : index
    %0 = vector.load %arg1[%c0, %c0_0] : memref<16x32xf32, #tpu.memory_space<vmem>>, vector<16x32xf32>
    %c0_1 = arith.constant 0 : index
    %c0_2 = arith.constant 0 : index
    %1 = vector.load %arg2[%c0_1, %c0_2] : memref<32x128xf32, #tpu.memory_space<vmem>>, vector<32x128xf32>
    %cst = arith.constant dense<0.000000e+00> : vector<16x128xf32>
    %2 = tpu.matmul %0, %1, %cst {dimension_numbers = #tpu.dot_dimension_numbers<[1], [0], [0], [1], [0, 0, 1, 1], [], []>} : vector<16x32xf32>, vector<32x128xf32>, vector<16x128xf32> -> vector<16x128xf32>
    %c0_3 = arith.constant 0 : index
    %c0_4 = arith.constant 0 : index
    %3 = vector.load %arg3[%c0_3, %c0_4] : memref<1x128xf32, #tpu.memory_space<vmem>>, vector<1x128xf32>
    %4 = vector.broadcast %3 : vector<1x128xf32> to vector<16x128xf32>
    %5 = arith.addf %2, %4 : vector<16x128xf32>
    %cst_5 = arith.constant 5.000000e-01 : f32
    %6 = vector.broadcast %cst_5 : f32 to vector<16x128xf32>
    %7 = arith.mulf %6, %5 : vector<16x128xf32>
    %cst_6 = arith.constant 4.471500e-02 : f32
    %8 = vector.broadcast %cst_6 : f32 to vector<16x128xf32>
    %9 = arith.mulf %8, %5 : vector<16x128xf32>
    %10 = arith.mulf %9, %5 : vector<16x128xf32>
    %11 = arith.mulf %10, %5 : vector<16x128xf32>
    %12 = arith.addf %5, %11 : vector<16x128xf32>
    %cst_7 = arith.constant 0.797884583 : f32
    %13 = vector.broadcast %cst_7 : f32 to vector<16x128xf32>
    %14 = arith.mulf %13, %12 : vector<16x128xf32>
    %15 = math.tanh %14 : vector<16x128xf32>
    %cst_8 = arith.constant 1.000000e+00 : f32
    %16 = vector.broadcast %cst_8 : f32 to vector<16x128xf32>
    %17 = arith.addf %16, %15 : vector<16x128xf32>
    %18 = arith.mulf %7, %17 : vector<16x128xf32>
    %c0_9 = arith.constant 0 : index
    %c0_10 = arith.constant 0 : index
    %19 = vector.load %arg4[%c0_9, %c0_10] : memref<128x32xf32, #tpu.memory_space<vmem>>, vector<128x32xf32>
    %cst_11 = arith.constant dense<0.000000e+00> : vector<16x32xf32>
    %20 = tpu.matmul %18, %19, %cst_11 {dimension_numbers = #tpu.dot_dimension_numbers<[1], [0], [0], [1], [0, 0, 1, 1], [], []>} : vector<16x128xf32>, vector<128x32xf32>, vector<16x32xf32> -> vector<16x32xf32>
    %c0_12 = arith.constant 0 : index
    %c0_13 = arith.constant 0 : index
    %21 = vector.load %arg5[%c0_12, %c0_13] : memref<1x32xf32, #tpu.memory_space<vmem>>, vector<1x32xf32>
    %22 = vector.broadcast %21 : vector<1x32xf32> to vector<16x32xf32>
    %23 = arith.addf %20, %22 : vector<16x32xf32>
    %c0_14 = arith.constant 0 : index
    %c0_15 = arith.constant 0 : index
    %24 = vector.load %arg6[%c0_14, %c0_15] : memref<16x32xf32, #tpu.memory_space<vmem>>, vector<16x32xf32>
    tpu.vector_store %arg6[%c0_14, %c0_15], %23 {strides = array<i32>} : memref<16x32xf32, #tpu.memory_space<vmem>>, vector<16x32xf32>,
    return
  }
  func.func @transform_0(%arg0: i32) -> (i32, i32) {
    %c0_i32 = arith.constant 0 : i32
    %c0_i32_0 = arith.constant 0 : i32
    return %arg0, %c0_i32 : i32, i32
  }
  func.func @transform_1(%arg0: i32) -> (i32, i32) {
    %c0_i32 = arith.constant 0 : i32
    %c0_i32_0 = arith.constant 0 : i32
    %c0_i32_1 = arith.constant 0 : i32
    return %c0_i32, %c0_i32_0 : i32, i32
  }
  func.func @transform_2(%arg0: i32) -> (i32, i32) {
    %c0_i32 = arith.constant 0 : i32
    %c0_i32_0 = arith.constant 0 : i32
    %c0_i32_1 = arith.constant 0 : i32
    return %c0_i32, %c0_i32_0 : i32, i32
  }
  func.func @transform_3(%arg0: i32) -> (i32, i32) {
    %c0_i32 = arith.constant 0 : i32
    %c0_i32_0 = arith.constant 0 : i32
    %c0_i32_1 = arith.constant 0 : i32
    return %c0_i32, %c0_i32_0 : i32, i32
  }
  func.func @transform_4(%arg0: i32) -> (i32, i32) {
    %c0_i32 = arith.constant 0 : i32
    %c0_i32_0 = arith.constant 0 : i32
    %c0_i32_1 = arith.constant 0 : i32
    return %c0_i32, %c0_i32_0 : i32, i32
  }
  func.func @transform_5(%arg0: i32) -> (i32, i32) {
    %c0_i32 = arith.constant 0 : i32
    %c0_i32_0 = arith.constant 0 : i32
    return %arg0, %c0_i32 : i32, i32
  }
}

</mosaic_0001>

<bundles_post_ra>
// kernel: mlp_forward.1
= control target key start
LH: loop header
LB: loop body
LE: loop exit
PB: predicated region body
PF: predicated region fallthrough
CT: control target
= control target key end

     0   :  { %vm34_vm0 = vcmask 261120   ;;  %s516_s0 = inlined_call_operand.vmem [shape: f32[16,32], index: 0, kind: input, shape index: {}]   ;;  %s517_s1 = inlined_call_operand.vmem [shape: f32[32,128], index: 1, kind: input, shape index: {}]   ;;  %s518_s2 = inlined_call_operand.vmem [shape: f32[1,128], index: 2, kind: input, shape index: {}]   ;;  %s519_s3 = inlined_call_operand.vmem [shape: f32[128,32], index: 3, kind: input, shape index: {}]   ;;  %s520_s4 = inlined_call_operand.vmem [shape: f32[1,32], index: 4, kind: input, shape index: {}]   ;;  %s521_s5 = inlined_call_operand.hbm [shape: f32[16,32], index: 5, kind: output, shape index: {}]  }
   0x1   :  { %v23_v0 = vld [vmem:[%s517_s1] sm:$0xff]  ;;  %v24_v1 = vld [vmem:[%s517_s1 + $0x8] sm:$0xff]  ;;  %v25_v2 = vld [vmem:[%s517_s1 + $0x10] sm:$0xff] }
   0x2   :  { %v324_v3 = vpack.c.bf16 %v24_v1, %v23_v0  ;;  %v26_v4 = vld [vmem:[%s517_s1 + $0x18] sm:$0xff]  ;;  %v21_v5 = vld [vmem:[%s516_s0] sm:$0xff]  ;;  %v135_v8 = vld [vmem:[%s519_s3 + $0x8] sm:$0xff] }
   0x3   :  { %v328_v6 = vpack.c.bf16 %v26_v4, %v25_v2  ;;  %286 = vmatprep.mubr.msk.f32.mxu0 %vm34_vm0, %v21_v5  ;;  %v134_v7 = vld [vmem:[%s519_s3] sm:$0xff] }
   0x4   :  { %10 = vsyncpa [#allocation3], 0  ;;  %325 = vmatprep.subr.bf16.mxu0 %v324_v3  ;;  %v332_v9 = vpack.c.bf16 %v135_v8, %v134_v7  ;;  %v22_v10 = vld [vmem:[%s516_s0 + $0x8] sm:$0xff]  ;;  %v136_v11 = vld [vmem:[%s519_s3 + $0x10] sm:$0xff]  ;;  %s395_s11 = smov [#allocation2]  }
   0x5   :  { %327 = vmatpush3.bf16.msra.mxu0 %v324_v3  ;;  %v137_v12 = vld [vmem:[%s519_s3 + $0x18] sm:$0xff]  ;;  %v138_v14 = vld [vmem:[%s519_s3 + $0x20] sm:$0xff]  ;;  %v139_v15 = vld [vmem:[%s519_s3 + $0x28] sm:$0xff]  ;;  %s239_s12 = sshll.u32 %s395_s11, 4  ;;  %s240_s12 = int_to_ptr.vmem [resolvable:$true] %s239_s12 }
   0x6   :  { %329 = vmatprep.subr.bf16.mxu0 %v328_v6  ;;  %333 = vmatprep.subr.bf16.mxu1 %v332_v9  ;;  %v336_v13 = vpack.c.bf16 %v137_v12, %v136_v11  ;;  %v340_v16 = vpack.c.bf16 %v139_v15, %v138_v14  ;;  %v140_v17 = vld [vmem:[%s519_s3 + $0x30] sm:$0xff]  ;;  %v141_v18 = vld [vmem:[%s519_s3 + $0x38] sm:$0xff]  ;;  %v142_v19 = vld [vmem:[%s519_s3 + $0x40] sm:$0xff]  ;;  %s371_s13 = scalar_lea.vmem %s240_s12, 256  ;;  %p376_p1 = scmp.lt.s32.totalorder %s240_s12, %s240_s12 }
   0x7   :  { %335 = vmatpush3.bf16.msra.mxu1 %v332_v9  ;;  %v344_v20 = vpack.c.bf16 %v141_v18, %v140_v17  ;;  %v143_v21 = vld [vmem:[%s519_s3 + $0x48] sm:$0xff]  ;;  %v144_v23 = vld [vmem:[%s519_s3 + $0x50] sm:$0xff]  ;;  %v145_v24 = vld [vmem:[%s519_s3 + $0x58] sm:$0xff]  ;;  %p372_p0 = scmp.ne.s32.totalorder %s240_s12, %s371_s13  ;;  %p377_p2 = scmp.lt.s32.totalorder %s371_s13, %s371_s13 }
   0x8   :  { %337 = vmatprep.subr.bf16.mxu1 %v336_v13  ;;  %v348_v22 = vpack.c.bf16 %v143_v21, %v142_v19  ;;  %v352_v25 = vpack.c.bf16 %v145_v24, %v144_v23  ;;  %v146_v26 = vld [vmem:[%s519_s3 + $0x60] sm:$0xff]  ;;  %v147_v27 = vld [vmem:[%s519_s3 + $0x68] sm:$0xff]  ;;  %v148_v29 = vld [vmem:[%s519_s3 + $0x70] sm:$0xff] }
   0x9   :  { %331 = vmatpush3.bf16.msra.mxu0 %v328_v6  ;;  %v356_v28 = vpack.c.bf16 %v147_v27, %v146_v26  ;;  %v149_v30 = vld [vmem:[%s519_s3 + $0x78] sm:$0xff]  ;;  %v250_v32 = vld [vmem:[%s518_s2] ss:$0 sm:$0xff]  ;;  %p378_p3 = por %p377_p2, %p376_p1 }
   0xa   :  { %v360_v31 = vpack.c.bf16 %v149_v30, %v148_v29  ;;  %v253_v55 = vld [vmem:[%s520_s4] ss:$0 sm:$0xff] }
   0xb   :  { %339 = vmatpush3.bf16.msra.mxu1 %v336_v13  ;;  %p379_p4 = pnand %p378_p3, %p372_p0 }
   0xc   :  { %287 = vmatmul.mubr.msk.f32.vlgmr.msra.gmra.mrb[0].mxu0 %vm34_vm0, %v22_v10  ;;  %341 = vmatprep.subr.bf16.mxu1 %v340_v16 }
   0xf   :  { %343 = vmatpush3.bf16.msra.mxu1 %v340_v16 }
  0x10   :  { %345 = vmatprep.subr.bf16.mxu1 %v344_v20 }
  0x13   :  { %347 = vmatpush3.bf16.msra.mxu1 %v344_v20 }
  0x14   :  { %349 = vmatprep.subr.bf16.mxu1 %v348_v22 }
  0x17   :  { %351 = vmatpush3.bf16.msra.mxu1 %v348_v22 }
  0x18   :  { %353 = vmatprep.subr.bf16.mxu1 %v352_v25 }
  0x1b   :  { %355 = vmatpush3.bf16.msra.mxu1 %v352_v25 }
  0x1c   :  { %357 = vmatprep.subr.bf16.mxu1 %v356_v28 }
  0x1f   :  { %359 = vmatpush3.bf16.msra.mxu1 %v356_v28 }
  0x20   :  { %361 = vmatprep.subr.bf16.mxu1 %v360_v31 }
  0x23   :  { %363 = vmatpush3.bf16.msra.mxu1 %v360_v31 }
  0xdf   :  { %v288_v33 = vpop.f32.mrb[0].mxu0 }
  0xe0   :  { %v113_v34 = vadd.f32 %v288_v33, %v250_v32  ;;  %v107_v35 = vpop.f32.mrb[1].mxu0 }
  0xe1   :  { %v108_v36 = vadd.f32 %v250_v32, %v107_v35 }
  0xe2   :  { %v119_v37 = vmul.f32 0.044715, %v113_v34  ;;  %v117_v52 = vmul.f32 0.5, %v113_v34 }
  0xe3   :  { %v118_v38 = vmul.f32 0.044715, %v108_v36  ;;  %v116_v50 = vmul.f32 0.5, %v108_v36 }
  0xe4   :  { %v121_v39 = vmul.f32 %v119_v37, %v113_v34 }
  0xe5   :  { %v120_v40 = vmul.f32 %v118_v38, %v108_v36 }
  0xe6   :  { %v123_v41 = vmul.f32 %v121_v39, %v113_v34 }
  0xe7   :  { %v122_v42 = vmul.f32 %v120_v40, %v108_v36 }
  0xe8   :  { %v125_v43 = vadd.f32 %v123_v41, %v113_v34 }
  0xe9   :  { %v124_v44 = vadd.f32 %v122_v42, %v108_v36 }
  0xea   :  { %v127_v45 = vmul.f32 0.7978846, %v125_v43 }
  0xeb   :  { %v126_v46 = vmul.f32 0.7978846, %v124_v44 }
  0xec   :  { %367 = vtanh.f32 %v127_v45 }
  0xed   :  { %369 = vtanh.f32 %v126_v46 }
  0xf6   :  { %v368_v47 = vpop.eup %367 }
  0xf7   :  { %v370_v48 = vpop.eup %369  ;;  %v131_v49 = vadd.f32 1.0, %v368_v47 }
  0xf8   :  { %v130_v51 = vadd.f32 1.0, %v370_v48 }
  0xf9   :  { %v133_v54 = vmul.f32 %v131_v49, %v117_v52 }
  0xfa   :  { %v132_v53 = vmul.f32 %v130_v51, %v116_v50 }
  0xfc   :  { %321 = vmatprep.mubr.f32.mxu1 %v132_v53 }
  0xfd   :  { %322 = vmatmul.mubr.f32.vlgmr.msra.gmra.mrb[0].mxu1 %v133_v54 }
 0x1d0   :  { %v323_v56 = vpop.f32.mrb[0].mxu1 }
 0x1d1   :  { %v229_v57 = vadd.f32 %v323_v56, %v253_v55  ;;  %v223_v58 = vpop.f32.mrb[1].mxu1 }
 0x1d2   :  { %v224_v59 = vadd.f32 %v253_v55, %v223_v58 }
 0x1d3   :  { %233 = vst.msk [vmem:[#allocation2 + $0x8] sm:$0xff] %vm34_vm0, %v229_v57 }
 0x1d4   :  { %232 = vst.msk [vmem:[#allocation2] sm:$0xff] %vm34_vm0, %v224_v59 }
 0x1d5   :  { %382 = shalt.err (!%p379_p4)
}
 0x1d6   :  { %s383_s15 = scalar_lea.hbm %s521_s5, 256 }
 0x1d7   :  { %p384_p5 = scmp.ne.s32.totalorder %s521_s5, %s383_s15  ;;  %p387_p6 = scmp.lt.u32.totalorder %s383_s15, %s521_s5 }
 0x1d9   :  { %p389_p7 = pnand %p387_p6, %p384_p5 }
 0x1db   :  { %392 = shalt.err (!%p389_p7)
}
 0x1dc   :  { %s396_s19 = smov 128   ;;  %s397_s20 = smov 8  }
 0x1dd   :  { %245 = dma.vmem_to_hbm [thread:$0]  %s240_s12, 256, %s521_s5, [#allocation3], %s396_s19, %s396_s19, %s397_s20  }
 0x1de   :  { %393 = dma.done.wait [#allocation3], 256  }
 0x1df   :  { %394 = vsyncadd [#allocation3], 4294967040 }
 0x1e0   :  { %249 = vsyncpa [#allocation3], 1 }

</bundles_post_ra>
